<compile_context>
chip_gen: v7x
topology: tpu7x:2x2x1
jax: 0.10.0
libtpu: 0.0.40
codegen_flags: <defaults>
</compile_context>

<pallas_src>
import functools
import math

import jax
import jax.numpy as jnp
from jax.experimental import pallas as pl
from jax.experimental.pallas import tpu as pltpu


def hybrid_ranker_kernel(repr_ref, w_ref, b_ref, labels_ref,
                         scores_ref, loss_ref, *, B, C, H):
    # (B*C, H) pooled candidate representations.  Upcast only if the producer
    # shipped bf16 (halves HBM->VMEM bytes); all arithmetic stays f32 (v5e has
    # no bf16 VALU/EUP).
    x = repr_ref[...]
    if x.dtype != jnp.float32:
        x = x.astype(jnp.float32)
    w = w_ref[...]                                   # (1, H)
    if w.dtype != jnp.float32:
        w = w.astype(jnp.float32)
    labels = labels_ref[...]                         # (B, C)
    if labels.dtype != jnp.float32:
        labels = labels.astype(jnp.float32)
    bias = b_ref[0]                                  # scalar bias from SMEM

    # candidate_net: nn.Linear(H, 1) applied per candidate -> scores (B, C).
    if H >= 256:
        # Real BERT hidden (e.g. 768): push the H-reduction onto the otherwise
        # idle MXU instead of VALU multiplies + XLU cross-lane reduces.
        scores = (jnp.dot(x, w.T, preferred_element_type=jnp.float32)
                  .reshape(B, C)) + bias
    else:
        # Tiny H (<=128): VPU multiply + lane reduce is cheaper than the MXU.
        scores = jnp.sum((x * w).reshape(B, C, H), axis=-1) + bias

    # loss = -sum(labels * log_softmax(scores, dim=1), dim=1).mean()
    # Computed on the unpadded (B, C) scores so output-lane padding cannot leak
    # into max/exp/lse.
    m = jnp.max(scores, axis=1, keepdims=True)
    z = scores - m
    lse = jnp.log(jnp.sum(jnp.exp(z), axis=1, keepdims=True))
    log_sm = z - lse
    per_example = -jnp.sum(labels * log_sm, axis=1, keepdims=True)   # (B, 1)
    loss = jnp.sum(per_example) * (1.0 / B)

    # Lane-dense output slab: one full unmasked store of the (B, C_pad) block,
    # then fill the C valid lanes.
    scores_ref[...] = jnp.zeros_like(scores_ref)
    scores_ref[:, :C] = scores
    loss_ref[0] = loss                               # scalar loss via SMEM


def hybrid_ranker_forward(cand_path_repr, reason_paths_labels, w, b):
    """cand_path_repr: (B, C, H) pooled candidate reprs; labels: (B, C)."""
    B, C, H = cand_path_repr.shape
    c_pad = 128 * pl.cdiv(C, 128)                    # lane-dense scores width

    x2d = cand_path_repr.reshape(B * C, H)           # pack rows into sublanes
    b1 = b.reshape(1).astype(jnp.float32)            # (1,) SMEM scalar
    labels = reason_paths_labels.astype(jnp.float32)

    kernel = functools.partial(hybrid_ranker_kernel, B=B, C=C, H=H)
    scores_pad, loss = pl.pallas_call(
        kernel,
        out_shape=(
            jax.ShapeDtypeStruct((B, c_pad), jnp.float32),   # lane-dense scores
            jax.ShapeDtypeStruct((1,), jnp.float32),         # scalar loss
        ),
        in_specs=[
            pl.BlockSpec((B * C, H), lambda: (0, 0)),        # candidate reprs
            pl.BlockSpec((1, H), lambda: (0, 0)),            # Linear weight
            pl.BlockSpec(memory_space=pltpu.MemorySpace.SMEM),  # bias scalar
            pl.BlockSpec((B, C), lambda: (0, 0)),            # labels
        ],
        out_specs=(
            pl.BlockSpec((B, c_pad), lambda: (0, 0)),
            pl.BlockSpec(memory_space=pltpu.MemorySpace.SMEM),  # loss scalar
        ),
    )(x2d, w, b1, labels)
    return {"loss": loss[0], "cand_scores": scores_pad[:, :C]}


if __name__ == "__main__":
    batch_size, num_cands, hidden = 2, 8, 32

    key = jax.random.PRNGKey(0)
    k_repr, k_w, k_b, k_lab = jax.random.split(key, 4)

    # Synthetic "BERT pooled output" for batch_size*num_cands candidates,
    # reshaped to (batch, num_cands, hidden) as in forward().
    pooled = jnp.tanh(
        jax.random.normal(k_repr, (batch_size * num_cands, hidden), jnp.float32)
    )
    cand_path_repr = pooled.reshape(batch_size, num_cands, hidden)

    # candidate_net = nn.Linear(hidden, 1) with xavier_uniform_ weight init.
    xavier_bound = math.sqrt(6.0 / (hidden + 1))
    w = jax.random.uniform(
        k_w, (1, hidden), jnp.float32, minval=-xavier_bound, maxval=xavier_bound
    )
    bias_bound = 1.0 / math.sqrt(hidden)  # PyTorch Linear default bias init
    b = jax.random.uniform(
        k_b, (1,), jnp.float32, minval=-bias_bound, maxval=bias_bound
    )

    # reason_paths_labels: one-hot gold-path labels per example.
    gold = jax.random.randint(k_lab, (batch_size,), 0, num_cands)
    labels = jax.nn.one_hot(gold, num_cands, dtype=jnp.float32)

    out = hybrid_ranker_forward(cand_path_repr, labels, w, b)
    jax.block_until_ready(out)

    # Pure-JAX reference check.
    ref_scores = jnp.einsum("bch,oh->bco", cand_path_repr, w)[..., 0] + b[0]
    ref_loss = jnp.mean(
        -jnp.sum(labels * jax.nn.log_softmax(ref_scores, axis=1), axis=1)
    )
    assert jnp.allclose(out["cand_scores"], ref_scores, atol=1e-5, rtol=1e-5)
    assert jnp.allclose(out["loss"], ref_loss, atol=1e-5, rtol=1e-5)

    print("KERNEL_OK")
</pallas_src>

<mosaic_0001>
module attributes {stable_mosaic.version = 11 : i64} {
  func.func @hybrid_ranker_kernel(%arg0: memref<16x32xf32, #tpu.memory_space<vmem>>, %arg1: memref<1x32xf32, #tpu.memory_space<vmem>>, %arg2: memref<1xf32, #tpu.memory_space<smem>>, %arg3: memref<2x8xf32, #tpu.memory_space<vmem>>, %arg4: memref<2x128xf32, #tpu.memory_space<vmem>>, %arg5: memref<1xf32, #tpu.memory_space<smem>>) attributes {dimension_semantics = [], scalar_prefetch = 0 : i64, scratch_operands = 0 : i64, tpu.core_type = #tpu.core_type<tc>} {
    %c0 = arith.constant 0 : index
    %c0_0 = arith.constant 0 : index
    %0 = vector.load %arg0[%c0, %c0_0] : memref<16x32xf32, #tpu.memory_space<vmem>>, vector<16x32xf32>
    %c0_1 = arith.constant 0 : index
    %c0_2 = arith.constant 0 : index
    %1 = vector.load %arg1[%c0_1, %c0_2] : memref<1x32xf32, #tpu.memory_space<vmem>>, vector<1x32xf32>
    %c0_3 = arith.constant 0 : index
    %c0_4 = arith.constant 0 : index
    %2 = vector.load %arg3[%c0_3, %c0_4] : memref<2x8xf32, #tpu.memory_space<vmem>>, vector<2x8xf32>
    %c0_5 = arith.constant 0 : index
    %3 = memref.load %arg2[%c0_5] : memref<1xf32, #tpu.memory_space<smem>>
    %4 = vector.broadcast %1 : vector<1x32xf32> to vector<16x32xf32>
    %5 = arith.mulf %0, %4 : vector<16x32xf32>
    %6 = vector.shape_cast %5 : vector<16x32xf32> to vector<2x8x32xf32>
    %cst = arith.constant dense<0.000000e+00> : vector<2x8xf32>
    %7 = vector.multi_reduction <add>, %6, %cst [2] : vector<2x8x32xf32> to vector<2x8xf32>
    %8 = vector.broadcast %3 : f32 to vector<2x8xf32>
    %9 = arith.addf %7, %8 : vector<2x8xf32>
    %cst_6 = arith.constant dense<0xFF800000> : vector<2xf32>
    %10 = vector.multi_reduction <maximumf>, %9, %cst_6 [1] : vector<2x8xf32> to vector<2xf32>
    %11 = vector.shape_cast %10 : vector<2xf32> to vector<2x1xf32>
    %12 = vector.broadcast %11 : vector<2x1xf32> to vector<2x8xf32>
    %13 = arith.subf %9, %12 : vector<2x8xf32>
    %14 = math.exp %13 : vector<2x8xf32>
    %cst_7 = arith.constant dense<0.000000e+00> : vector<2xf32>
    %15 = vector.multi_reduction <add>, %14, %cst_7 [1] : vector<2x8xf32> to vector<2xf32>
    %16 = vector.shape_cast %15 : vector<2xf32> to vector<2x1xf32>
    %17 = math.log %16 : vector<2x1xf32>
    %18 = vector.broadcast %17 : vector<2x1xf32> to vector<2x8xf32>
    %19 = arith.subf %13, %18 : vector<2x8xf32>
    %20 = arith.mulf %2, %19 : vector<2x8xf32>
    %cst_8 = arith.constant dense<0.000000e+00> : vector<2xf32>
    %21 = vector.multi_reduction <add>, %20, %cst_8 [1] : vector<2x8xf32> to vector<2xf32>
    %22 = vector.shape_cast %21 : vector<2xf32> to vector<2x1xf32>
    %cst_9 = arith.constant 0.000000e+00 : f32
    %23 = vector.broadcast %cst_9 : f32 to vector<2x1xf32>
    %24 = arith.subf %23, %22 : vector<2x1xf32>
    %25 = vector.shape_cast %24 : vector<2x1xf32> to vector<1x2x1xf32>
    %cst_10 = arith.constant dense<0.000000e+00> : vector<1xf32>
    %26 = vector.multi_reduction <add>, %25, %cst_10 [1, 2] : vector<1x2x1xf32> to vector<1xf32>
    %27 = vector.shape_cast %26 : vector<1xf32> to vector<1x1x1xf32>
    %28 = vector.extract %27[0, 0, 0] : f32 from vector<1x1x1xf32>
    %cst_11 = arith.constant 5.000000e-01 : f32
    %29 = arith.mulf %28, %cst_11 : f32
    %cst_12 = arith.constant 0.000000e+00 : f32
    %30 = vector.broadcast %cst_12 : f32 to vector<2x128xf32>
    %c0_13 = arith.constant 0 : index
    %c0_14 = arith.constant 0 : index
    %31 = vector.load %arg4[%c0_13, %c0_14] : memref<2x128xf32, #tpu.memory_space<vmem>>, vector<2x128xf32>
    tpu.vector_store %arg4[%c0_13, %c0_14], %30 {strides = array<i32>} : memref<2x128xf32, #tpu.memory_space<vmem>>, vector<2x128xf32>,
    %c0_15 = arith.constant 0 : index
    %c0_16 = arith.constant 0 : index
    %32 = vector.load %arg4[%c0_15, %c0_16] : memref<2x128xf32, #tpu.memory_space<vmem>>, vector<2x8xf32>
    tpu.vector_store %arg4[%c0_15, %c0_16], %9 {strides = array<i32>} : memref<2x128xf32, #tpu.memory_space<vmem>>, vector<2x8xf32>,
    %c0_17 = arith.constant 0 : index
    %33 = memref.load %arg5[%c0_17] : memref<1xf32, #tpu.memory_space<smem>>
    memref.store %29, %arg5[%c0_17] : memref<1xf32, #tpu.memory_space<smem>>
    return
  }
}

</mosaic_0001>

<bundles_post_ra>
// kernel: tpu_custom_call.1
= control target key start
LH: loop header
LB: loop body
LE: loop exit
PB: predicated region body
PF: predicated region fallthrough
CT: control target
= control target key end

     0   :  { %12 = vsyncpa [#allocation4], 0  ;;  %s365_s0 = inlined_call_operand.hbm [shape: f32[16,32], index: 0, kind: input, shape index: {}]   ;;  %s366_s1 = inlined_call_operand.vmem [shape: f32[1,32], index: 1, kind: input, shape index: {}]   ;;  %s367_s2 = inlined_call_operand.<no memory space> [shape: f32[1], index: 2, kind: input, shape index: {}]   ;;  %s368_s3 = inlined_call_operand.vmem [shape: f32[2,8], index: 3, kind: input, shape index: {}]   ;;  %s369_s4 = inlined_call_operand.hbm [shape: f32[2,128], index: 4, kind: output, shape index: {0}]   ;;  %s370_s5 = inlined_call_operand.hbm [shape: f32[1], index: 5, kind: output, shape index: {1}]  }
   0x1   :  { %13 = vsyncpa [#allocation5], 0 }
   0x2   :  { %14 = vsyncpa [#allocation6], 0  ;;  %s276_s18 = smov [#allocation3]   ;;  %s216_s22 = scalar_lea.hbm %s365_s0, 256 }
   0x3   :  { %s20_s19 = sshll.u32 %s276_s18, 4  ;;  %p217_p0 = scmp.ne.s32.totalorder %s365_s0, %s216_s22  ;;  %s21_s19 = int_to_ptr.vmem [resolvable:$true] %s20_s19 }
   0x4   :  { %p220_p1 = scmp.lt.u32.totalorder %s216_s22, %s365_s0 }
   0x6   :  { %p222_p2 = pnand %p220_p1, %p217_p0 }
   0x8   :  { %225 = shalt.err (!%p222_p2)
}
   0x9   :  { %s226_s27 = scalar_lea.vmem %s21_s19, 256  ;;  %p231_p4 = scmp.lt.s32.totalorder %s21_s19, %s21_s19 }
   0xa   :  { %p227_p3 = scmp.ne.s32.totalorder %s21_s19, %s226_s27  ;;  %p232_p5 = scmp.lt.s32.totalorder %s226_s27, %s226_s27 }
   0xc   :  { %p233_p6 = por %p232_p5, %p231_p4 }
   0xe   :  { %p234_p7 = pnand %p233_p6, %p227_p3 }
  0x10   :  { %237 = shalt.err (!%p234_p7)
}
  0x11   :  { %s277_s28 = smov 128   ;;  %s278_s29 = smov 8  }
  0x12   :  { %26 = dma.hbm_to_vmem [thread:$0]  %s365_s0, 256, %s21_s19, [#allocation4], %s277_s28, %s277_s28, %s278_s29  }
  0x13   :  { %270 = dma.done.wait [#allocation4], 256  }
  0x14   :  { %271 = vsyncadd [#allocation4], 4294967040  ;;  %v36_v0 = vld [vmem:[#allocation3] sm:$0xff]  ;;  %vm49_vm0 = vcmask 261120   ;;  %v37_v2 = vld [vmem:[#allocation3 + $0x8] sm:$0xff]  ;;  %v279_v7 = vmov 0.0   ;;  %v61_v8 = vlaneseq  ;;  %v56_v11 = vstv %s367_s2 }
  0x15   :  { %v198_v1 = vld [vmem:[%s366_s1] ss:$0 sm:$0xff]  ;;  %166 = vst [vmem:[#allocation7] sm:$0x3] %v279_v7  ;;  %vm71_vm1 = vcmask 1041409   ;;  %vm74_vm2 = vcmask 58368  }
  0x16   :  { %v47_v3 = vmul.f32 %v198_v1, %v36_v0  ;;  %v48_v4 = vmul.f32 %v198_v1, %v37_v2  ;;  %v62_v9 = vand.u32 127, %v61_v8  ;;  %v64_v10 = vshrl.u32 %v61_v8, 7  ;;  %v39_v50 = vld [vmem:[%s368_s3] sm:$0x3]  ;;  %s281_s10 = smov [#allocation7]  }
  0x17   :  { %v280_v21 = vmov 0   ;;  %vm154_vm3 = vcmask 1024   ;;  %s176_s11 = sshll.u32 %s281_s10, 4  ;;  %s177_s11 = int_to_ptr.vmem [resolvable:$true] %s176_s11 }
  0x18   :  { %v50_v5 = vsel %vm49_vm0, %v47_v3, 0.0  ;;  %v53_v6 = vsel %vm49_vm0, %v48_v4, 0.0  ;;  %v65_v13 = vsub.s32 %v62_v9, %v64_v10  ;;  %209 = vset.pattern.permute.xlu0 %v280_v21  ;;  %208 = vset.pattern.permute.xlu1 %v280_v21  ;;  %v81_v22 = vsub.s32 0, %v64_v10  ;;  %s238_s12 = scalar_lea.vmem %s177_s11, 32  ;;  %p243_p9 = scmp.lt.s32.totalorder %s177_s11, %s177_s11 }
  0x19   :  { %51 = vadd.xlane.f32.xlu0 %v50_v5  ;;  %v85_v23 = vsub.s32 1, %v64_v10  ;;  %p239_p8 = scmp.ne.s32.totalorder %s177_s11, %s238_s12  ;;  %p244_p10 = scmp.lt.s32.totalorder %s238_s12, %s238_s12 }
  0x1b   :  { %p245_p11 = por %p244_p10, %p243_p9 }
  0x1d   :  { %54 = vadd.xlane.f32.xlu0 %v53_v6  ;;  %p246_p12 = pnand %p245_p11, %p239_p8 }
  0xa6   :  { %v52_v12 = vpop.xlane.xlu0 %51 }
  0xa7   :  { %v57_v14 = vadd.f32 %v56_v11, %v52_v12 }
  0xa9   :  { %v66_v17 = vrot.slane %v57_v14, %v65_v13 }
  0xaa   :  { %v55_v15 = vpop.xlane.xlu0 %54 }
  0xab   :  { %v58_v16 = vadd.f32 %v56_v11, %v55_v15 }
  0xad   :  { %v70_v18 = vrot.slane %v58_v16, %v65_v13 }
  0xaf   :  { %v72_v19 = vsel %vm71_vm1, %v70_v18, %v66_v17 }
  0xb0   :  { %v75_v20 = vsel %vm74_vm2, %v72_v19, -inf  ;;  %167 = vst.msk [vmem:[#allocation7] sm:$0x3] %vm74_vm2, %v72_v19 }
  0xb1   :  { %76 = vmax.xlane.f32.xlu1 %v75_v20 }
 0x13e   :  { %v77_v24 = vpop.xlane.xlu1 %76 }
 0x13f   :  { %v82_v25 = vrot.slane %v77_v24, %v81_v22  ;;  %v86_v26 = vrot.slane %v77_v24, %v85_v23 }
 0x141   :  { %v89_v27 = vsub.f32 %v57_v14, %v82_v25  ;;  %v90_v28 = vsub.f32 %v58_v16, %v86_v26 }
 0x143   :  { %v91_v29 = vmul.f32 1.442695, %v89_v27  ;;  %v93_v30 = vmul.f32 1.442695, %v90_v28 }
 0x145   :  { %210 = vpow2.f32 %v91_v29 }
 0x146   :  { %212 = vpow2.f32 %v93_v30 }
 0x14f   :  { %v211_v31 = vpop.eup %210 }
 0x150   :  { %v213_v32 = vpop.eup %212  ;;  %98 = vperm.xlu1 %208, %v211_v31  }
 0x151   :  { %101 = vperm.xlu0 %209, %v213_v32  }
 0x1cf   :  { %v99_v33 = vpop.permute.xlu1 %98 }
 0x1d0   :  { %v102_v34 = vpop.permute.xlu0 %101  ;;  %v106_v35 = vrot.slane %v99_v33, %v65_v13 }
 0x1d1   :  { %v110_v36 = vrot.slane %v102_v34, %v65_v13 }
 0x1d3   :  { %v111_v37 = vsel %vm71_vm1, %v110_v36, %v106_v35 }
 0x1d4   :  { %v113_v38 = vsel %vm74_vm2, %v111_v37, 0.0 }
 0x1d5   :  { %114 = vadd.xlane.f32.xlu1 %v113_v38 }
 0x262   :  { %v115_v39 = vpop.xlane.xlu1 %114 }
 0x263   :  { %214 = vlog2.f32 %v115_v39 }
 0x26d   :  { %v215_v40 = vpop.eup %214 }
 0x26e   :  { %v117_v41 = vmul.f32 0.6931472, %v215_v40 }
 0x270   :  { %v122_v42 = vrot.slane %v117_v41, %v81_v22  ;;  %v126_v43 = vrot.slane %v117_v41, %v85_v23 }
 0x272   :  { %v129_v44 = vsub.f32 %v89_v27, %v122_v42  ;;  %v130_v45 = vsub.f32 %v90_v28, %v126_v43 }
 0x274   :  { %134 = vperm.xlu0 %209, %v129_v44  }
 0x278   :  { %137 = vperm.xlu0 %209, %v130_v45  }
 0x2f3   :  { %v135_v46 = vpop.permute.xlu0 %134 }
 0x2f4   :  { %v142_v48 = vrot.slane %v135_v46, %v65_v13 }
 0x2f7   :  { %v138_v47 = vpop.permute.xlu0 %137 }
 0x2f8   :  { %v146_v49 = vrot.slane %v138_v47, %v65_v13 }
 0x2fa   :  { %v147_v51 = vsel %vm71_vm1, %v146_v49, %v142_v48 }
 0x2fb   :  { %v149_v52 = vmul.f32 %v147_v51, %v39_v50 }
 0x2fd   :  { %v150_v53 = vsel %vm74_vm2, %v149_v52, 0.0 }
 0x2fe   :  { %151 = vadd.xlane.f32.xlu1 %v150_v53 }
 0x38b   :  { %v152_v54 = vpop.xlane.xlu1 %151 }
 0x38c   :  { %v153_v55 = vsub.f32 0.0, %v152_v54 }
 0x38e   :  { %v155_v56 = vsel %vm154_vm3, %v153_v55, 0.0 }
 0x38f   :  { %156 = vadd.xlane.f32.xlu0 %v155_v56 }
 0x390   :  { %249 = shalt.err (!%p246_p12)
}
 0x391   :  { %s250_s14 = scalar_lea.hbm %s369_s4, 32 }
 0x392   :  { %p251_p13 = scmp.ne.s32.totalorder %s369_s4, %s250_s14  ;;  %p254_p0 = scmp.lt.u32.totalorder %s250_s14, %s369_s4 }
 0x394   :  { %p256_p1 = pnand %p254_p0, %p251_p13 }
 0x396   :  { %259 = shalt.err (!%p256_p1)
}
 0x397   :  { %179 = dma.vmem_to_hbm [thread:$0]  %s177_s11, 32, %s369_s4, [#allocation5]  }
 0x398   :  { %s260_s25 = scalar_lea.hbm %s370_s5, 16 }
 0x399   :  { %p261_p2 = scmp.ne.s32.totalorder %s370_s5, %s260_s25  ;;  %p264_p3 = scmp.lt.u32.totalorder %s260_s25, %s370_s5 }
 0x39b   :  { %p266_p4 = pnand %p264_p3, %p261_p2 }
 0x41c   :  { %v157_v57 = vpop.xlane.xlu0 %156 }
 0x41d   :  { %v158_v58 = vrot.slane %v157_v57, 4 }
 0x41f   :  { %v159_v59 = vadd.f32 %v158_v58, %v157_v57 }
 0x421   :  { %v160_v60 = vrot.slane %v159_v59, 2 }
 0x423   :  { %v161_v61 = vadd.f32 %v160_v60, %v159_v59 }
 0x425   :  { %v162_v62 = vrot.slane %v161_v61, 1 }
 0x427   :  { %v163_v63 = vadd.f32 %v162_v62, %v161_v61 }
 0x429   :  { %199 = vpush %v163_v63 }
 0x45a   :  { %s200_s21 = spop %199 }
 0x45b   :  { %s165_s22 = smul.f32 0.5, %s200_s21 }
 0x45d   :  { %169 = sst [smem:[#allocation8]] %s165_s22 }
 0x45e   :  { %269 = shalt.err (!%p266_p4)
}
 0x45f   :  { %s282_s29 = smov [#allocation8]  }
 0x460   :  { %187 = dma.smem_to_hbm %s282_s29, 16, %s370_s5, [#allocation6]  }
 0x461   :  { %272 = dma.done.wait [#allocation5], 32  }
 0x462   :  { %273 = vsyncadd [#allocation5], 4294967264 }
 0x463   :  { %274 = dma.done.wait [#allocation6], 16  }
 0x464   :  { %275 = vsyncadd [#allocation6], 4294967280 }
 0x465   :  { %194 = sfence }
 0x466   :  { %195 = vsyncpa [#allocation4], 1 }
 0x467   :  { %196 = vsyncpa [#allocation5], 1 }
 0x468   :  { %197 = vsyncpa [#allocation6], 1 }

</bundles_post_ra>
